<compile_context>
chip_gen: v5e
topology: v5e:2x2
jax: 0.10.0
libtpu: 0.0.40
codegen_flags: <defaults>
</compile_context>

<pallas_src>
import jax
import jax.numpy as jnp
from jax.experimental import pallas as pl
from jax.experimental.pallas import tpu as pltpu

# Real (torch) layer sizes.
D_IN, D_H1, D_H2, D_OUT = 28 * 28, 100, 50, 10
# Lane-padded feature sizes (100/50/10 -> 128).
H1P, H2P, OUTP = 128, 128, 128


def _round_up(x, m):
    return ((x + m - 1) // m) * m


def fcn_kernel(x_ref, w1_ref, w2_ref, w3_ref, b_ref, out_ref):
    # x_ref:  (TB, 784) f32   (streamed batch tile)
    # w1_ref: (784, 128) bf16 (resident)
    # w2_ref: (128, 128) bf16 (resident)
    # w3_ref: (128, 128) bf16 (resident)
    # b_ref:  (8, 128)   f32  (resident; rows 0..2 = b1, b2, b3)
    # out_ref:(TB, 128)  bf16 (only first 10 columns are meaningful)
    x = x_ref[...].astype(jnp.bfloat16)                 # in-kernel cast (VPU)
    b = b_ref[...]

    h1 = jnp.dot(x, w1_ref[...], preferred_element_type=jnp.float32) + b[0:1, :]
    h1 = jnp.maximum(h1, 0.0)                           # ReLU

    h2 = jnp.dot(h1.astype(jnp.bfloat16), w2_ref[...],
                 preferred_element_type=jnp.float32) + b[1:2, :]
    h2 = jnp.maximum(h2, 0.0)                           # ReLU

    out = jnp.dot(h2.astype(jnp.bfloat16), w3_ref[...],
                  preferred_element_type=jnp.float32) + b[2:3, :]
    out_ref[...] = out.astype(out_ref.dtype)


def _pad2(a, rows, cols):
    r, c = a.shape
    return jnp.pad(a, ((0, rows - r), (0, cols - c)))


def prepare_params(params):
    """One-time prep: pad output dims to 128, cast weights to bf16, pack biases.

    Call once and reuse the result across forward passes (hoisted out of the
    per-call path).
    """
    w1, b1, w2, b2, w3, b3 = params
    w1p = _pad2(w1, D_IN, H1P).astype(jnp.bfloat16)     # (784, 128)
    w2p = _pad2(w2, H1P, H2P).astype(jnp.bfloat16)      # (128, 128)
    w3p = _pad2(w3, H2P, OUTP).astype(jnp.bfloat16)     # (128, 128)
    b_packed = jnp.zeros((8, OUTP), jnp.float32)        # padded cols stay 0
    b_packed = b_packed.at[0, :D_H1].set(b1.reshape(-1).astype(jnp.float32))
    b_packed = b_packed.at[1, :D_H2].set(b2.reshape(-1).astype(jnp.float32))
    b_packed = b_packed.at[2, :D_OUT].set(b3.reshape(-1).astype(jnp.float32))
    return w1p, w2p, w3p, b_packed


def _fcn_forward_impl(x_nchw, w1p, w2p, w3p, b_packed, *, tb=2048):
    """x_nchw: (B, 1, 28, 28) f32 -> logits (B, 10). Same semantics as torch FCN."""
    B = x_nchw.shape[0]
    x = x_nchw.reshape(B, D_IN)                         # x.view(-1, 784); free, stays f32

    # Tiling policy:
    #  * at least 2 grid steps whenever B > 8 (so both v7x TensorCores work),
    #  * TB is a multiple of 8 sublanes and capped at `tb`,
    #  * batch padding is < 8 rows per tile (no round_up(B, TB) blowup).
    num_tiles = max(pl.cdiv(B, tb), min(2, pl.cdiv(B, 8)))
    TB = _round_up(pl.cdiv(B, num_tiles), 8)
    B_pad = num_tiles * TB
    if B_pad != B:
        x = jnp.pad(x, ((0, B_pad - B), (0, 0)))        # <8 rows/tile; fused under jit

    weight_bytes = (D_IN * H1P + H1P * H2P + H2P * OUTP) * 2 + 8 * OUTP * 4
    cost = pl.CostEstimate(
        flops=2 * B_pad * (D_IN * D_H1 + D_H1 * D_H2 + D_H2 * D_OUT),
        transcendentals=0,
        bytes_accessed=B_pad * D_IN * 4 + weight_bytes + B_pad * OUTP * 2,
    )

    def resident(shape):
        return pl.BlockSpec(shape, lambda i: (0, 0))

    out_pad = pl.pallas_call(
        fcn_kernel,
        out_shape=jax.ShapeDtypeStruct((B_pad, OUTP), jnp.bfloat16),
        grid=(num_tiles,),
        in_specs=[
            pl.BlockSpec((TB, D_IN), lambda i: (i, 0)),  # streamed f32 x tiles
            resident((D_IN, H1P)),                       # w1 (resident)
            resident((H1P, H2P)),                        # w2 (resident)
            resident((H2P, OUTP)),                       # w3 (resident)
            resident((8, OUTP)),                         # packed biases (resident)
        ],
        out_specs=pl.BlockSpec((TB, OUTP), lambda i: (i, 0)),  # lane-dense bf16 stores
        compiler_params=pltpu.CompilerParams(
            dimension_semantics=("parallel",),           # megacore sharding on v7x
            vmem_limit_bytes=48 * 1024 * 1024,           # < v7x 64 MiB, > v5e 16 MiB default
        ),
        cost_estimate=cost,
    )(x, w1p, w2p, w3p, b_packed)

    # Slice real rows/columns; return f32 logits (tiny op) to match torch semantics.
    return out_pad[:B, :D_OUT].astype(jnp.float32)


fcn_forward = jax.jit(_fcn_forward_impl, static_argnames=("tb",))


def init_params(key):
    """Deterministic init mimicking nn.Linear default (U(-1/sqrt(fan_in), +1/sqrt(fan_in)))."""
    def linear(key, fan_in, fan_out):
        kw, kb = jax.random.split(key)
        bound = 1.0 / jnp.sqrt(fan_in)
        # Stored as (fan_in, fan_out) so the kernel computes x @ W
        # (equivalent to torch's x @ W.T with W of shape (fan_out, fan_in)).
        w = jax.random.uniform(kw, (fan_in, fan_out), jnp.float32, -bound, bound)
        b = jax.random.uniform(kb, (1, fan_out), jnp.float32, -bound, bound)
        return w, b

    k1, k2, k3 = jax.random.split(key, 3)
    w1, b1 = linear(k1, D_IN, D_H1)
    w2, b2 = linear(k2, D_H1, D_H2)
    w3, b3 = linear(k3, D_H2, D_OUT)
    return (w1, b1, w2, b2, w3, b3)


def fcn_reference(x_nchw, params):
    """Pure-JAX f32 reference for correctness checking."""
    w1, b1, w2, b2, w3, b3 = params
    x = x_nchw.reshape(x_nchw.shape[0], D_IN)
    h1 = jnp.maximum(x @ w1 + b1, 0.0)
    h2 = jnp.maximum(h1 @ w2 + b2, 0.0)
    return h2 @ w3 + b3


if __name__ == "__main__":
    key = jax.random.PRNGKey(0)
    kx, kp = jax.random.split(key)
    params = init_params(kp)
    prepped = prepare_params(params)            # hoisted one-time weight prep

    # Small MNIST-shaped batch (NCHW): single grid step, partial row padding.
    x_small = jax.random.normal(kx, (2, 1, 28, 28), dtype=jnp.float32)
    out_small = jax.block_until_ready(fcn_forward(x_small, *prepped))
    ref_small = fcn_reference(x_small, params)
    assert out_small.shape == (2, 10), out_small.shape
    # bf16 weights/activations (f32 accumulation) -> relaxed tolerance vs f32 reference.
    assert jnp.allclose(out_small, ref_small, atol=3e-2, rtol=3e-2), "mismatch (small batch)"

    # Larger ragged batch: multi-step grid, resident weights across steps,
    # <8-row batch padding and final slicing.
    x_big = jax.random.normal(kx, (300, 1, 28, 28), dtype=jnp.float32)
    out_big = jax.block_until_ready(fcn_forward(x_big, *prepped, tb=128))
    ref_big = fcn_reference(x_big, params)
    assert out_big.shape == (300, 10), out_big.shape
    assert jnp.allclose(out_big, ref_big, atol=3e-2, rtol=3e-2), "mismatch (tiled batch)"

    print("KERNEL_OK")
</pallas_src>

<mosaic_0001>
module attributes {stable_mosaic.version = 11 : i64} {
  func.func @fcn_kernel(%arg0: i32, %arg1: memref<8x784xf32, #tpu.memory_space<vmem>>, %arg2: memref<784x128xbf16, #tpu.memory_space<vmem>>, %arg3: memref<128x128xbf16, #tpu.memory_space<vmem>>, %arg4: memref<128x128xbf16, #tpu.memory_space<vmem>>, %arg5: memref<8x128xf32, #tpu.memory_space<vmem>>, %arg6: memref<8x128xbf16, #tpu.memory_space<vmem>>) attributes {dimension_semantics = [#tpu.dimension_semantics<parallel>], iteration_bounds = array<i64: 1>, scalar_prefetch = 0 : i64, scratch_operands = 0 : i64, tpu.core_type = #tpu.core_type<tc>, window_params = [{transform_indices = @transform_0, window_bounds = array<i64: 8, 784>}, {pipeline_mode = #tpu.pipeline_mode<synchronous>, transform_indices = @transform_1, window_bounds = array<i64: 784, 128>}, {pipeline_mode = #tpu.pipeline_mode<synchronous>, transform_indices = @transform_2, window_bounds = array<i64: 128, 128>}, {pipeline_mode = #tpu.pipeline_mode<synchronous>, transform_indices = @transform_3, window_bounds = array<i64: 128, 128>}, {pipeline_mode = #tpu.pipeline_mode<synchronous>, transform_indices = @transform_4, window_bounds = array<i64: 8, 128>}, {transform_indices = @transform_5, window_bounds = array<i64: 8, 128>}]} {
    %c0 = arith.constant 0 : index
    %c0_0 = arith.constant 0 : index
    %0 = vector.load %arg1[%c0, %c0_0] : memref<8x784xf32, #tpu.memory_space<vmem>>, vector<8x784xf32>
    %1 = arith.truncf %0 : vector<8x784xf32> to vector<8x784xbf16>
    %c0_1 = arith.constant 0 : index
    %c0_2 = arith.constant 0 : index
    %2 = vector.load %arg5[%c0_1, %c0_2] : memref<8x128xf32, #tpu.memory_space<vmem>>, vector<8x128xf32>
    %c0_3 = arith.constant 0 : index
    %c0_4 = arith.constant 0 : index
    %3 = vector.load %arg2[%c0_3, %c0_4] : memref<784x128xbf16, #tpu.memory_space<vmem>>, vector<784x128xbf16>
    %cst = arith.constant dense<0.000000e+00> : vector<8x128xf32>
    %4 = tpu.matmul %1, %3, %cst {dimension_numbers = #tpu.dot_dimension_numbers<[1], [0], [0], [1], [0, 0, 1, 1], [], []>} : vector<8x784xbf16>, vector<784x128xbf16>, vector<8x128xf32> -> vector<8x128xf32>
    %5 = vector.extract_strided_slice %2 {offsets = [0, 0], sizes = [1, 128], strides = [1, 1]} : vector<8x128xf32> to vector<1x128xf32>
    %6 = vector.broadcast %5 : vector<1x128xf32> to vector<8x128xf32>
    %7 = arith.addf %4, %6 : vector<8x128xf32>
    %cst_5 = arith.constant 0.000000e+00 : f32
    %8 = vector.broadcast %cst_5 : f32 to vector<8x128xf32>
    %9 = arith.maximumf %7, %8 : vector<8x128xf32>
    %10 = arith.truncf %9 : vector<8x128xf32> to vector<8x128xbf16>
    %c0_6 = arith.constant 0 : index
    %c0_7 = arith.constant 0 : index
    %11 = vector.load %arg3[%c0_6, %c0_7] : memref<128x128xbf16, #tpu.memory_space<vmem>>, vector<128x128xbf16>
    %cst_8 = arith.constant dense<0.000000e+00> : vector<8x128xf32>
    %12 = tpu.matmul %10, %11, %cst_8 {dimension_numbers = #tpu.dot_dimension_numbers<[1], [0], [0], [1], [0, 0, 1, 1], [], []>} : vector<8x128xbf16>, vector<128x128xbf16>, vector<8x128xf32> -> vector<8x128xf32>
    %13 = vector.extract_strided_slice %2 {offsets = [1, 0], sizes = [1, 128], strides = [1, 1]} : vector<8x128xf32> to vector<1x128xf32>
    %14 = vector.broadcast %13 : vector<1x128xf32> to vector<8x128xf32>
    %15 = arith.addf %12, %14 : vector<8x128xf32>
    %cst_9 = arith.constant 0.000000e+00 : f32
    %16 = vector.broadcast %cst_9 : f32 to vector<8x128xf32>
    %17 = arith.maximumf %15, %16 : vector<8x128xf32>
    %18 = arith.truncf %17 : vector<8x128xf32> to vector<8x128xbf16>
    %c0_10 = arith.constant 0 : index
    %c0_11 = arith.constant 0 : index
    %19 = vector.load %arg4[%c0_10, %c0_11] : memref<128x128xbf16, #tpu.memory_space<vmem>>, vector<128x128xbf16>
    %cst_12 = arith.constant dense<0.000000e+00> : vector<8x128xf32>
    %20 = tpu.matmul %18, %19, %cst_12 {dimension_numbers = #tpu.dot_dimension_numbers<[1], [0], [0], [1], [0, 0, 1, 1], [], []>} : vector<8x128xbf16>, vector<128x128xbf16>, vector<8x128xf32> -> vector<8x128xf32>
    %21 = vector.extract_strided_slice %2 {offsets = [2, 0], sizes = [1, 128], strides = [1, 1]} : vector<8x128xf32> to vector<1x128xf32>
    %22 = vector.broadcast %21 : vector<1x128xf32> to vector<8x128xf32>
    %23 = arith.addf %20, %22 : vector<8x128xf32>
    %24 = arith.truncf %23 : vector<8x128xf32> to vector<8x128xbf16>
    %c0_13 = arith.constant 0 : index
    %c0_14 = arith.constant 0 : index
    %25 = vector.load %arg6[%c0_13, %c0_14] : memref<8x128xbf16, #tpu.memory_space<vmem>>, vector<8x128xbf16>
    tpu.vector_store %arg6[%c0_13, %c0_14], %24 {strides = array<i32>} : memref<8x128xbf16, #tpu.memory_space<vmem>>, vector<8x128xbf16>,
    return
  }
  func.func @transform_0(%arg0: i32) -> (i32, i32) {
    %c0_i32 = arith.constant 0 : i32
    %c0_i32_0 = arith.constant 0 : i32
    return %arg0, %c0_i32 : i32, i32
  }
  func.func @transform_1(%arg0: i32) -> (i32, i32) {
    %c0_i32 = arith.constant 0 : i32
    %c0_i32_0 = arith.constant 0 : i32
    %c0_i32_1 = arith.constant 0 : i32
    return %c0_i32, %c0_i32_0 : i32, i32
  }
  func.func @transform_2(%arg0: i32) -> (i32, i32) {
    %c0_i32 = arith.constant 0 : i32
    %c0_i32_0 = arith.constant 0 : i32
    %c0_i32_1 = arith.constant 0 : i32
    return %c0_i32, %c0_i32_0 : i32, i32
  }
  func.func @transform_3(%arg0: i32) -> (i32, i32) {
    %c0_i32 = arith.constant 0 : i32
    %c0_i32_0 = arith.constant 0 : i32
    %c0_i32_1 = arith.constant 0 : i32
    return %c0_i32, %c0_i32_0 : i32, i32
  }
  func.func @transform_4(%arg0: i32) -> (i32, i32) {
    %c0_i32 = arith.constant 0 : i32
    %c0_i32_0 = arith.constant 0 : i32
    %c0_i32_1 = arith.constant 0 : i32
    return %c0_i32, %c0_i32_0 : i32, i32
  }
  func.func @transform_5(%arg0: i32) -> (i32, i32) {
    %c0_i32 = arith.constant 0 : i32
    %c0_i32_0 = arith.constant 0 : i32
    return %arg0, %c0_i32 : i32, i32
  }
}

</mosaic_0001>

<bundles_post_ra>
// kernel: _fcn_forward_impl.1
= control target key start
LH: loop header
LB: loop body
LE: loop exit
PB: predicated region body
PF: predicated region fallthrough
CT: control target
= control target key end

     0   :  { %10 = vsyncpa [#allocation3], 0  ;;  %s1062_s21 = smov [#allocation2]   ;;  %s1063_s23 = smov 64   ;;  %s1173_s0 = inlined_call_operand.vmem [shape: f32[8,784], index: 0, kind: input, shape index: {}]   ;;  %s1174_s1 = inlined_call_operand.hbm [shape: bf16[784,128], index: 1, kind: input, shape index: {}]   ;;  %s1175_s2 = inlined_call_operand.vmem [shape: bf16[128,128], index: 2, kind: input, shape index: {}]   ;;  %s1176_s3 = inlined_call_operand.vmem [shape: bf16[128,128], index: 3, kind: input, shape index: {}]   ;;  %s1177_s4 = inlined_call_operand.vmem [shape: f32[8,128], index: 4, kind: input, shape index: {}]   ;;  %s1178_s5 = inlined_call_operand.vmem [shape: bf16[8,128], index: 5, kind: output, shape index: {}]  }
   0x1   :  { %s17_s20 = sshll.u32 %s1174_s1, 4  ;;  %s19_s22 = sshll.u32 %s1062_s21, 4  ;;  %s18_s20 = int_to_ptr.hbm [resolvable:$true] %s17_s20  ;;  %s20_s22 = int_to_ptr.vmem [resolvable:$true] %s19_s22 }
   0x2   :  { %s1064_s24 = smov 4  }
   0x3   :  { %25 = dma.hbm_to_vmem [thread:$0]  %s18_s20, 6272, %s20_s22, [#allocation3], %s1063_s23, %s1063_s23, %s1064_s24  }
   0x4   :  { %1060 = dma.done.wait [#allocation3], 6272  }
   0x5   :  { %1061 = vsyncadd [#allocation3], 4294961024  ;;  %v975_v0 = vld [vmem:[#allocation2 + $0x38] sm:$0xff]  ;;  %v974_v3 = vld [vmem:[#allocation2 + $0x30] sm:$0xff]  ;;  %vm445_vm0 = vcmask 130048  }
   0x6   :  { %v983_v1 = vld [vmem:[#allocation2 + $0x78] sm:$0xff]  ;;  %449 = vmatpush.bf16.msra.mxu0 %v975_v0  ;;  %v982_v4 = vld [vmem:[#allocation2 + $0x70] sm:$0xff]  ;;  %v973_v8 = vld [vmem:[#allocation2 + $0x28] sm:$0xff] }
   0x7   :  { %v991_v2 = vld [vmem:[#allocation2 + $0xb8] sm:$0xff]  ;;  %462 = vmatpush.bf16.msra.mxu1 %v983_v1  ;;  %v990_v5 = vld [vmem:[#allocation2 + $0xb0] sm:$0xff]  ;;  %v981_v9 = vld [vmem:[#allocation2 + $0x68] sm:$0xff] }
   0x8   :  { %475 = vmatpush.bf16.msra.mxu2 %v991_v2  ;;  %v999_v6 = vld [vmem:[#allocation2 + $0xf8] sm:$0xff]  ;;  %v998_v7 = vld [vmem:[#allocation2 + $0xf0] sm:$0xff]  ;;  %v989_v10 = vld [vmem:[#allocation2 + $0xa8] sm:$0xff] }
   0x9   :  { %488 = vmatpush.bf16.msra.mxu3 %v999_v6  ;;  %v997_v11 = vld [vmem:[#allocation2 + $0xe8] sm:$0xff]  ;;  %v972_v12 = vld [vmem:[#allocation2 + $0x20] sm:$0xff]  ;;  %v971_v16 = vld [vmem:[#allocation2 + $0x18] sm:$0xff] }
   0xa   :  { %450 = vmatpush.bf16.msra.mxu0 %v974_v3  ;;  %v980_v13 = vld [vmem:[#allocation2 + $0x60] sm:$0xff]  ;;  %v979_v17 = vld [vmem:[#allocation2 + $0x58] sm:$0xff]  ;;  %v970_v20 = vld [vmem:[#allocation2 + $0x10] sm:$0xff] }
   0xb   :  { %463 = vmatpush.bf16.msra.mxu1 %v982_v4  ;;  %v988_v14 = vld [vmem:[#allocation2 + $0xa0] sm:$0xff]  ;;  %v987_v18 = vld [vmem:[#allocation2 + $0x98] sm:$0xff]  ;;  %v978_v21 = vld [vmem:[#allocation2 + $0x50] sm:$0xff] }
   0xc   :  { %476 = vmatpush.bf16.msra.mxu2 %v990_v5  ;;  %v996_v15 = vld [vmem:[#allocation2 + $0xe0] sm:$0xff]  ;;  %v995_v19 = vld [vmem:[#allocation2 + $0xd8] sm:$0xff]  ;;  %v986_v22 = vld [vmem:[#allocation2 + $0x90] sm:$0xff] }
   0xd   :  { %489 = vmatpush.bf16.msra.mxu3 %v998_v7  ;;  %v994_v23 = vld [vmem:[#allocation2 + $0xd0] sm:$0xff]  ;;  %v969_v24 = vld [vmem:[#allocation2 + $0x8] sm:$0xff]  ;;  %v968_v27 = vld [vmem:[#allocation2] sm:$0xff] }
   0xe   :  { %451 = vmatpush.bf16.msra.mxu0 %v973_v8  ;;  %v977_v25 = vld [vmem:[#allocation2 + $0x48] sm:$0xff]  ;;  %v976_v29 = vld [vmem:[#allocation2 + $0x40] sm:$0xff]  ;;  %v1007_v32 = vld [vmem:[#allocation2 + $0x138] sm:$0xff] }
   0xf   :  { %464 = vmatpush.bf16.msra.mxu1 %v981_v9  ;;  %v985_v26 = vld [vmem:[#allocation2 + $0x88] sm:$0xff]  ;;  %v37_v30 = vld [vmem:[%s1173_s0] sm:$0xff]  ;;  %v1015_v33 = vld [vmem:[#allocation2 + $0x178] sm:$0xff] }
  0x10   :  { %477 = vmatpush.bf16.msra.mxu2 %v989_v10  ;;  %v993_v28 = vld [vmem:[#allocation2 + $0xc8] sm:$0xff]  ;;  %v984_v34 = vld [vmem:[#allocation2 + $0x80] sm:$0xff]  ;;  %v39_v35 = vld [vmem:[%s1173_s0 + $0x10] sm:$0xff]  ;;  %v44_v36 = vpack.c.bf16 %v37_v30, %v37_v30 }
  0x11   :  { %490 = vmatpush.bf16.msra.mxu3 %v997_v11  ;;  %v38_v31 = vld [vmem:[%s1173_s0 + $0x8] sm:$0xff]  ;;  %v992_v38 = vld [vmem:[#allocation2 + $0xc0] sm:$0xff]  ;;  %v40_v40 = vld [vmem:[%s1173_s0 + $0x18] sm:$0xff]  ;;  %v46_v43 = vpack.c.bf16 %v39_v35, %v39_v35 }
  0x12   :  { %452 = vmatpush.bf16.msra.mxu0 %v972_v12  ;;  %v45_v37 = vpack.c.bf16 %v38_v31, %v38_v31  ;;  %v1016_v39 = vld [vmem:[#allocation2 + $0x180] sm:$0xff]  ;;  %v1006_v41 = vld [vmem:[#allocation2 + $0x130] sm:$0xff]  ;;  %v47_v44 = vpack.c.bf16 %v40_v40, %v40_v40  ;;  %v1005_v45 = vld [vmem:[#allocation2 + $0x128] sm:$0xff] }
  0x13   :  { %465 = vmatpush.bf16.msra.mxu1 %v980_v13  ;;  %v1014_v42 = vld [vmem:[#allocation2 + $0x170] sm:$0xff]  ;;  %v1013_v46 = vld [vmem:[#allocation2 + $0x168] sm:$0xff]  ;;  %v1004_v47 = vld [vmem:[#allocation2 + $0x120] sm:$0xff] }
  0x14   :  { %478 = vmatpush.bf16.msra.mxu2 %v988_v14  ;;  %v1012_v48 = vld [vmem:[#allocation2 + $0x160] sm:$0xff]  ;;  %v1003_v49 = vld [vmem:[#allocation2 + $0x118] sm:$0xff]  ;;  %v43_v51 = vld [vmem:[%s1173_s0 + $0x30] sm:$0xff] }
  0x15   :  { %491 = vmatpush.bf16.msra.mxu3 %v996_v15  ;;  %v1011_v50 = vld [vmem:[#allocation2 + $0x158] sm:$0xff]  ;;  %v1002_v52 = vld [vmem:[#allocation2 + $0x110] sm:$0xff]  ;;  %v50_v54 = vpack.c.bf16 %v43_v51, %v43_v51  ;;  %v1001_v55 = vld [vmem:[#allocation2 + $0x108] sm:$0xff] }
  0x16   :  { %453 = vmatpush.bf16.msra.mxu0 %v971_v16  ;;  %v1010_v53 = vld [vmem:[#allocation2 + $0x150] sm:$0xff]  ;;  %v1009_v56 = vld [vmem:[#allocation2 + $0x148] sm:$0xff]  ;;  %v1000_v57 = vld [vmem:[#allocation2 + $0x100] sm:$0xff] }
  0x17   :  { %466 = vmatpush.bf16.msra.mxu1 %v979_v17  ;;  %v1008_v58 = vld [vmem:[#allocation2 + $0x140] sm:$0xff]  ;;  %v42_v60 = vld [vmem:[%s1173_s0 + $0x28] sm:$0xff]  ;;  %v1024_v63 = vld [vmem:[%s1175_s2 + $0x38] sm:$0xff] }
  0x18   :  { %479 = vmatpush.bf16.msra.mxu2 %v987_v18  ;;  %v41_v59 = vld [vmem:[%s1173_s0 + $0x20] sm:$0xff]  ;;  %v49_v62 = vpack.c.bf16 %v42_v60, %v42_v60  ;;  %v1023_v0 = vld [vmem:[%s1175_s2 + $0x30] sm:$0xff]  ;;  %v1022_v1 = vld [vmem:[%s1175_s2 + $0x28] sm:$0xff] }
  0x19   :  { %492 = vmatpush.bf16.msra.mxu3 %v995_v19  ;;  %v48_v61 = vpack.c.bf16 %v41_v59, %v41_v59  ;;  %v1021_v2 = vld [vmem:[%s1175_s2 + $0x20] sm:$0xff]  ;;  %v1020_v3 = vld [vmem:[%s1175_s2 + $0x18] sm:$0xff]  ;;  %v1019_v4 = vld [vmem:[%s1175_s2 + $0x10] sm:$0xff] }
  0x1a   :  { %454 = vmatpush.bf16.msra.mxu0 %v970_v20  ;;  %v1018_v5 = vld [vmem:[%s1175_s2 + $0x8] sm:$0xff]  ;;  %v1017_v8 = vld [vmem:[%s1175_s2] sm:$0xff]  ;;  %v1032_v11 = vld [vmem:[%s1176_s3 + $0x38] sm:$0xff] }
  0x1b   :  { %467 = vmatpush.bf16.msra.mxu1 %v978_v21  ;;  %v51_v12 = vld [vmem:[%s1177_s4] sm:$0xff]  ;;  %v1031_v15 = vld [vmem:[%s1176_s3 + $0x30] sm:$0xff]  ;;  %v1030_v17 = vld [vmem:[%s1176_s3 + $0x28] sm:$0xff] }
  0x1c   :  { %480 = vmatpush.bf16.msra.mxu2 %v986_v22  ;;  %v150_v16 = vperm.slane %v51_v12, 0  ;;  %v1029_v21 = vld [vmem:[%s1176_s3 + $0x20] sm:$0xff]  ;;  %v558_v40 = vperm.slane %v51_v12, 1 }
  0x1d   :  { %493 = vmatpush.bf16.msra.mxu3 %v994_v23  ;;  %v1028_v23 = vld [vmem:[%s1176_s3 + $0x18] sm:$0xff] }
  0x1e   :  { %455 = vmatpush.bf16.msra.mxu0 %v969_v24 }
  0x1f   :  { %468 = vmatpush.bf16.msra.mxu1 %v977_v25 }
  0x20   :  { %481 = vmatpush.bf16.msra.mxu2 %v985_v26  ;;  %v1027_v26 = vld [vmem:[%s1176_s3 + $0x10] sm:$0xff] }
  0x21   :  { %494 = vmatpush.bf16.msra.mxu3 %v993_v28 }
  0x22   :  { %456 = vmatpush.bf16.msra.mxu0 %v968_v27 }
  0x23   :  { %469 = vmatpush.bf16.msra.mxu1 %v976_v29 }
  0x24   :  { %482 = vmatpush.bf16.msra.mxu2 %v984_v34 }
  0x25   :  { %457 = vmatmul.bf16.vlgmr.msra.gmra.mxu0 %v44_v36  ;;  %495 = vmatpush.bf16.msra.mxu3 %v992_v38  ;;  %v1026_v38 = vld [vmem:[%s1176_s3 + $0x8] sm:$0xff] }
  0x26   :  { %501 = vmatpush.bf16.msrb.mxu0 %v1007_v32  ;;  %470 = vmatmul.bf16.vlgmr.msra.gmra.mxu1 %v45_v37 }
  0x27   :  { %514 = vmatpush.bf16.msrb.mxu1 %v1015_v33  ;;  %483 = vmatmul.bf16.vlgmr.msra.gmra.mxu2 %v46_v43 }
  0x28   :  { %534 = vmatpush.bf16.msrb.mxu2 %v1016_v39  ;;  %496 = vmatmul.bf16.vlgmr.msra.gmra.mxu3 %v47_v44  ;;  %v1025_v39 = vld [vmem:[%s1176_s3] sm:$0xff] }
  0x29   :  { %607 = vmatpush.bf16.msrb.mxu3 %v1024_v63 }
  0x2a   :  { %502 = vmatpush.bf16.msrb.mxu0 %v1006_v41 }
  0x2b   :  { %515 = vmatpush.bf16.msrb.mxu1 %v1014_v42 }
  0x2c   :  { %687 = vmatpush.bf16.msra.mxu2 %v1032_v11 }
  0x2d   :  { %608 = vmatpush.bf16.msrb.mxu3 %v1023_v0 }
  0x2e   :  { %503 = vmatpush.bf16.msrb.mxu0 %v1005_v45 }
  0x2f   :  { %516 = vmatpush.bf16.msrb.mxu1 %v1013_v46  ;;  %v638_v46 = vperm.slane %v51_v12, 2 }
  0x30   :  { %688 = vmatpush.bf16.msra.mxu2 %v1031_v15 }
  0x31   :  { %609 = vmatpush.bf16.msrb.mxu3 %v1022_v1 }
  0x32   :  { %504 = vmatpush.bf16.msrb.mxu0 %v1004_v47 }
  0x33   :  { %517 = vmatpush.bf16.msrb.mxu1 %v1012_v48 }
  0x34   :  { %689 = vmatpush.bf16.msra.mxu2 %v1030_v17 }
  0x35   :  { %610 = vmatpush.bf16.msrb.mxu3 %v1021_v2 }
  0x36   :  { %505 = vmatpush.bf16.msrb.mxu0 %v1003_v49 }
  0x37   :  { %518 = vmatpush.bf16.msrb.mxu1 %v1011_v50  ;;  %903 = vmatmul.msk.bf16.vlgmr.msrb.gmra.mxu2 %vm445_vm0, %v50_v54 }
  0x38   :  { %690 = vmatpush.bf16.msra.mxu2 %v1029_v21 }
  0x39   :  { %611 = vmatpush.bf16.msrb.mxu3 %v1020_v3 }
  0x3a   :  { %506 = vmatpush.bf16.msrb.mxu0 %v1002_v52 }
  0x3b   :  { %519 = vmatpush.bf16.msrb.mxu1 %v1010_v53 }
  0x3c   :  { %691 = vmatpush.bf16.msra.mxu2 %v1028_v23 }
  0x3d   :  { %612 = vmatpush.bf16.msrb.mxu3 %v1019_v4 }
  0x3e   :  { %507 = vmatpush.bf16.msrb.mxu0 %v1001_v55 }
  0x3f   :  { %520 = vmatpush.bf16.msrb.mxu1 %v1009_v56 }
  0x40   :  { %692 = vmatpush.bf16.msra.mxu2 %v1027_v26 }
  0x41   :  { %613 = vmatpush.bf16.msrb.mxu3 %v1018_v5 }
  0x42   :  { %508 = vmatpush.bf16.msrb.mxu0 %v1000_v57 }
  0x43   :  { %521 = vmatpush.bf16.msrb.mxu1 %v1008_v58 }
  0x44   :  { %693 = vmatpush.bf16.msra.mxu2 %v1026_v38 }
  0x45   :  { %509 = vmatmul.bf16.vlgmr.msrb.gmra.mxu0 %v48_v61  ;;  %614 = vmatpush.bf16.msrb.mxu3 %v1017_v8 }
  0x46   :  { %522 = vmatmul.bf16.vlgmr.msrb.gmra.mxu1 %v49_v62 }
  0x48   :  { %694 = vmatpush.bf16.msra.mxu2 %v1025_v39 }
  0xa2   :  { %v458_v6 = vpop.f32.mrf.mxu0 }
  0xa3   :  { %v471_v7 = vpop.f32.mrf.mxu1  ;;  %v459_v18 = vadd.f32 %v458_v6, %v150_v16 }
  0xa5   :  { %v472_v22 = vadd.f32 %v471_v7, %v459_v18 }
  0xaa   :  { %v460_v9 = vpop.f32.mrf.mxu0  ;;  %v484_v13 = vpop.f32.mrf.mxu2 }
  0xab   :  { %v473_v10 = vpop.f32.mrf.mxu1  ;;  %v497_v14 = vpop.f32.mrf.mxu3  ;;  %v485_v24 = vadd.f32 %v484_v13, %v472_v22 }
  0xad   :  { %v498_v27 = vadd.f32 %v497_v14, %v485_v24 }
  0xb2   :  { %v486_v19 = vpop.f32.mrf.mxu2 }
  0xb3   :  { %v499_v20 = vpop.f32.mrf.mxu3 }
  0xba   :  { %v536_v25 = vpop.f32.mrf.mxu2 }
  0xc2   :  { %v510_v28 = vpop.f32.mrf.mxu0  ;;  %v538_v32 = vpop.f32.mrf.mxu2 }
  0xc3   :  { %v523_v29 = vpop.f32.mrf.mxu1  ;;  %v511_v30 = vadd.f32 %v510_v28, %v498_v27 }
  0xc5   :  { %v524_v31 = vadd.f32 %v523_v29, %v511_v30 }
  0xc7   :  { %v537_v33 = vadd.f32 %v536_v25, %v524_v31 }
  0xc9   :  { %v540_v34 = vmax.f32 %v537_v33, 0.0 }
  0xca   :  { %v512_v35 = vpop.f32.mrf.mxu0 }
  0xcb   :  { %v525_v36 = vpop.f32.mrf.mxu1  ;;  %v541_v37 = vpack.c.bf16 %v540_v34, %v540_v34 }
  0xcd   :  { %615 = vmatmul.bf16.vlgmr.msrb.gmra.mxu3 %v541_v37 }
 0x150   :  { %v616_v41 = vpop.f32.mrf.mxu3 }
 0x151   :  { %v617_v42 = vadd.f32 %v616_v41, %v558_v40 }
 0x153   :  { %v620_v43 = vmax.f32 %v617_v42, 0.0 }
 0x155   :  { %v621_v44 = vpack.c.bf16 %v620_v43, %v620_v43 }
 0x157   :  { %695 = vmatmul.bf16.vlgmr.msra.gmra.mxu2 %v621_v44 }
 0x158   :  { %v618_v45 = vpop.f32.mrf.mxu3 }
 0x1da   :  { %v696_v47 = vpop.f32.mrf.mxu2 }
 0x1db   :  { %v697_v48 = vadd.f32 %v696_v47, %v638_v46 }
 0x1dd   :  { %v700_v49 = vpack.c.bf16 %v697_v48, %v697_v48 }
 0x1df   :  { %701 = vst [vmem:[%s1178_s5] sm:$0xf] %v700_v49 }
 0x1e2   :  { %v698_v50 = vpop.f32.mrf.mxu2 }
 0x1e3   :  { %706 = vsyncpa [#allocation3], 1 }

</bundles_post_ra>
